<compile_context>
chip_gen: v7x
topology: tpu7x:2x2x1
jax: 0.10.0
libtpu: 0.0.40
codegen_flags: <defaults>
</compile_context>

<pallas_src>
import jax
import jax.numpy as jnp
from jax import lax
from jax.experimental import pallas as pl
from jax.experimental.pallas import tpu as pltpu


def br_kernel(x_ref, p_ref, o_ref):
    # p_ref: (TR, 3) f32, columns = (scale, shift, alpha), broadcast over lanes.
    x = x_ref[...].astype(jnp.float32)        # (TR, THW)
    scale = p_ref[:, 0:1]
    shift = p_ref[:, 1:2]
    alpha = p_ref[:, 2:3]
    y = x * scale + shift                     # BN: eval-mode per-row affine
    o_ref[...] = jnp.where(y > 0, y, alpha * y).astype(o_ref.dtype)


def _round_up(x, m):
    return (x + m - 1) // m * m


def _device_defaults():
    """Per-generation (target_block_bytes, vmem_limit_bytes)."""
    kind = ""
    try:
        kind = jax.devices()[0].device_kind.lower()
    except Exception:
        pass
    if "v7" in kind:
        # 3.2 TB/s HBM: amortize ~0.35us/step overhead with ~6 MiB blocks.
        # 4 double-buffered 6 MiB buffers = 24 MiB << 48 MiB (64 MiB physical).
        return 6 << 20, 48 << 20
    if "v5" in kind:
        # Keep modest blocks; the explicit limit overrides v5e's 16 MiB default.
        return 2 << 20, 48 << 20
    # v6e and unknown: 4 MiB blocks fit comfortably.
    return 4 << 20, 48 << 20


def br_forward(x_nchw, gamma, beta, running_mean, running_var, alpha,
               eps=1e-5, block_rows=None, block_hw=None,
               target_block_bytes=None, vmem_limit_bytes=None):
    """x_nchw: (N, C, H, W). Returns (N, C, H, W), same dtype as input."""
    N, C, H, W = x_nchw.shape
    HW = H * W
    rows = N * C
    dt = x_nchw.dtype
    itemsize = jnp.dtype(dt).itemsize

    dflt_target, dflt_vmem = _device_defaults()
    if target_block_bytes is None:
        target_block_bytes = dflt_target
    if vmem_limit_bytes is None:
        vmem_limit_bytes = dflt_vmem

    # ---- Fold BN (eval mode) into per-channel scale/shift (tiny JAX glue). ----
    inv_std = lax.rsqrt(running_var.astype(jnp.float32) + eps)          # (C,)
    scale_c = gamma.astype(jnp.float32) * inv_std                       # (C,)
    shift_c = beta.astype(jnp.float32) - running_mean.astype(jnp.float32) * scale_c
    # PReLU weight may be per-channel (C,) or shared (1,): broadcast to (C,).
    alpha_c = jnp.broadcast_to(jnp.asarray(alpha, jnp.float32).reshape(-1), (C,))

    # Per-row params (row = n*C + c -> channel c), packed as (rows, 3) f32 so a
    # single tiny DMA covers all three per row-block.
    params_c = jnp.stack([scale_c, shift_c, alpha_c], axis=-1)          # (C, 3)
    params_r = jnp.tile(params_c, (N, 1))                               # (rows, 3)

    # ---- Tiling: lane block multiple of 128; sublane multiple dtype-dependent
    # (8 f32 / 16 bf16 / 32 int8) so packed sublanes stay dense. ----
    LANE = 128
    SUB = max(8, 32 // itemsize)

    hw_ceil = _round_up(HW, LANE)
    rows_ceil = _round_up(rows, SUB)

    if block_hw is None:
        # Cap the HW block so at least SUB rows still fit the byte target.
        cap = max(LANE, (target_block_bytes // (SUB * itemsize)) // LANE * LANE)
        block_hw = min(hw_ceil, cap)
    else:
        block_hw = min(hw_ceil, _round_up(block_hw, LANE))

    if block_rows is None:
        br = max(SUB, (target_block_bytes // (block_hw * itemsize)) // SUB * SUB)
        block_rows = min(rows_ceil, br)
    else:
        block_rows = min(rows_ceil, _round_up(block_rows, SUB))

    grid_r = pl.cdiv(rows, block_rows)
    grid_h = pl.cdiv(HW, block_hw)

    # If a big tensor collapses to a single grid step, split one axis so both
    # TensorCores (v7x megacore) get work. Skip for tiny tensors.
    if grid_r * grid_h == 1 and rows * HW * itemsize >= (1 << 20):
        if hw_ceil >= 2 * LANE:
            block_hw = _round_up(pl.cdiv(HW, 2), LANE)
            grid_h = pl.cdiv(HW, block_hw)
        elif rows_ceil >= 2 * SUB:
            block_rows = _round_up(pl.cdiv(rows, 2), SUB)
            grid_r = pl.cdiv(rows, block_rows)

    x2d = x_nchw.reshape(rows, HW)   # contiguous view, no data movement

    out2d = pl.pallas_call(
        br_kernel,
        out_shape=jax.ShapeDtypeStruct((rows, HW), dt),
        grid_spec=pltpu.PrefetchScalarGridSpec(
            num_scalar_prefetch=0,
            grid=(grid_r, grid_h),
            in_specs=[
                pl.BlockSpec((block_rows, block_hw), lambda i, j: (i, j)),
                # Params indexed only by the row axis -> constant over the HW
                # (inner) axis, so their DMA fires once per row-block change.
                pl.BlockSpec((block_rows, 3), lambda i, j: (i, 0)),
            ],
            out_specs=pl.BlockSpec((block_rows, block_hw), lambda i, j: (i, j)),
        ),
        compiler_params=pltpu.CompilerParams(
            dimension_semantics=("parallel", "parallel"),
            vmem_limit_bytes=vmem_limit_bytes),
    )(x2d, params_r)

    return out2d.reshape(N, C, H, W)


def _reference(x, gamma, beta, running_mean, running_var, alpha, eps=1e-5):
    C = x.shape[1]
    inv = 1.0 / jnp.sqrt(running_var + eps)
    sc = (gamma * inv).reshape(1, C, 1, 1)
    sh = (beta - running_mean * gamma * inv).reshape(1, C, 1, 1)
    y = x * sc + sh
    a = jnp.asarray(alpha, jnp.float32).reshape(1, -1, 1, 1)
    return jnp.where(y > 0, y, a * y)


if __name__ == "__main__":
    key = jax.random.PRNGKey(0)
    k1, k2, k3 = jax.random.split(key, 3)

    # Case 1: small aligned shape consistent with the module: N=2, C=4, H=W=16.
    N, C, H, W = 2, 4, 16, 16
    x = jax.random.normal(k1, (N, C, H, W), dtype=jnp.float32)
    gamma = jnp.linspace(0.5, 1.5, C, dtype=jnp.float32)      # bn.weight
    beta = jnp.linspace(-0.1, 0.1, C, dtype=jnp.float32)      # bn.bias
    running_mean = jnp.linspace(-0.2, 0.2, C, dtype=jnp.float32)
    running_var = jnp.linspace(0.5, 1.5, C, dtype=jnp.float32)
    alpha = jnp.full((C,), 0.25, jnp.float32)                 # prelu.weight

    out = br_forward(x, gamma, beta, running_mean, running_var, alpha)
    jax.block_until_ready(out)
    ref = _reference(x, gamma, beta, running_mean, running_var, alpha)
    assert jnp.allclose(out, ref, atol=1e-5, rtol=1e-5), "mismatch vs reference (case 1)"

    # Case 2: ragged shapes (rows not a multiple of 8, HW not a multiple of 128)
    # exercising the pad-free edge-block path.
    N2, C2, H2, W2 = 2, 3, 10, 10
    x2 = jax.random.normal(k2, (N2, C2, H2, W2), dtype=jnp.float32)
    gamma2 = jnp.linspace(0.8, 1.2, C2, dtype=jnp.float32)
    beta2 = jnp.linspace(-0.05, 0.05, C2, dtype=jnp.float32)
    rmean2 = jnp.linspace(-0.1, 0.1, C2, dtype=jnp.float32)
    rvar2 = jnp.linspace(0.7, 1.3, C2, dtype=jnp.float32)
    alpha2 = jnp.full((C2,), 0.25, jnp.float32)

    out2 = br_forward(x2, gamma2, beta2, rmean2, rvar2, alpha2)
    jax.block_until_ready(out2)
    ref2 = _reference(x2, gamma2, beta2, rmean2, rvar2, alpha2)
    assert jnp.allclose(out2, ref2, atol=1e-5, rtol=1e-5), "mismatch vs reference (case 2)"

    # Case 3: bf16 activations + shared single-parameter PReLU (alpha shape (1,)).
    N3, C3, H3, W3 = 1, 4, 12, 12
    x3 = jax.random.normal(k3, (N3, C3, H3, W3), dtype=jnp.float32).astype(jnp.bfloat16)
    gamma3 = jnp.linspace(0.9, 1.1, C3, dtype=jnp.float32)
    beta3 = jnp.linspace(-0.02, 0.02, C3, dtype=jnp.float32)
    rmean3 = jnp.zeros((C3,), jnp.float32)
    rvar3 = jnp.ones((C3,), jnp.float32)
    alpha3 = jnp.array([0.1], jnp.float32)

    out3 = br_forward(x3, gamma3, beta3, rmean3, rvar3, alpha3)
    jax.block_until_ready(out3)
    ref3 = _reference(x3.astype(jnp.float32), gamma3, beta3, rmean3, rvar3, alpha3)
    assert jnp.allclose(out3.astype(jnp.float32), ref3, atol=5e-2, rtol=5e-2), \
        "mismatch vs reference (case 3)"

    print("KERNEL_OK")
</pallas_src>

<mosaic_0001>
module attributes {stable_mosaic.version = 11 : i64} {
  func.func @br_kernel(%arg0: i32, %arg1: i32, %arg2: memref<8x256xf32, #tpu.memory_space<vmem>>, %arg3: memref<8x3xf32, #tpu.memory_space<vmem>>, %arg4: memref<8x256xf32, #tpu.memory_space<vmem>>) attributes {dimension_semantics = [#tpu.dimension_semantics<parallel>, #tpu.dimension_semantics<parallel>], iteration_bounds = array<i64: 1, 1>, scalar_prefetch = 0 : i64, scratch_operands = 0 : i64, tpu.core_type = #tpu.core_type<tc>, window_params = [{transform_indices = @transform_0, window_bounds = array<i64: 8, 256>}, {transform_indices = @transform_1, window_bounds = array<i64: 8, 3>}, {transform_indices = @transform_2, window_bounds = array<i64: 8, 256>}]} {
    %c0 = arith.constant 0 : index
    %c0_0 = arith.constant 0 : index
    %0 = vector.load %arg2[%c0, %c0_0] : memref<8x256xf32, #tpu.memory_space<vmem>>, vector<8x256xf32>
    %c0_1 = arith.constant 0 : index
    %c0_2 = arith.constant 0 : index
    %1 = vector.load %arg3[%c0_1, %c0_2] : memref<8x3xf32, #tpu.memory_space<vmem>>, vector<8x1xf32>
    %c0_3 = arith.constant 0 : index
    %c1 = arith.constant 1 : index
    %2 = vector.load %arg3[%c0_3, %c1] : memref<8x3xf32, #tpu.memory_space<vmem>>, vector<8x1xf32>
    %c0_4 = arith.constant 0 : index
    %c2 = arith.constant 2 : index
    %3 = vector.load %arg3[%c0_4, %c2] : memref<8x3xf32, #tpu.memory_space<vmem>>, vector<8x1xf32>
    %4 = vector.broadcast %1 : vector<8x1xf32> to vector<8x256xf32>
    %5 = arith.mulf %0, %4 : vector<8x256xf32>
    %6 = vector.broadcast %2 : vector<8x1xf32> to vector<8x256xf32>
    %7 = arith.addf %5, %6 : vector<8x256xf32>
    %cst = arith.constant 0.000000e+00 : f32
    %8 = vector.broadcast %cst : f32 to vector<8x256xf32>
    %9 = arith.cmpf ogt, %7, %8 : vector<8x256xf32>
    %10 = vector.broadcast %3 : vector<8x1xf32> to vector<8x256xf32>
    %11 = arith.mulf %10, %7 : vector<8x256xf32>
    %12 = arith.select %9, %7, %11 : vector<8x256xi1>, vector<8x256xf32>
    %c0_5 = arith.constant 0 : index
    %c0_6 = arith.constant 0 : index
    %13 = vector.load %arg4[%c0_5, %c0_6] : memref<8x256xf32, #tpu.memory_space<vmem>>, vector<8x256xf32>
    tpu.vector_store %arg4[%c0_5, %c0_6], %12 {strides = array<i32>} : memref<8x256xf32, #tpu.memory_space<vmem>>, vector<8x256xf32>,
    return
  }
  func.func @transform_0(%arg0: i32, %arg1: i32) -> (i32, i32) {
    %c0_i32 = arith.constant 0 : i32
    return %arg0, %arg1 : i32, i32
  }
  func.func @transform_1(%arg0: i32, %arg1: i32) -> (i32, i32) {
    %c0_i32 = arith.constant 0 : i32
    %c0_i32_0 = arith.constant 0 : i32
    return %arg0, %c0_i32 : i32, i32
  }
  func.func @transform_2(%arg0: i32, %arg1: i32) -> (i32, i32) {
    %c0_i32 = arith.constant 0 : i32
    return %arg0, %arg1 : i32, i32
  }
}

</mosaic_0001>

<bundles_post_ra>
// kernel: tpu_custom_call.1
= control target key start
LH: loop header
LB: loop body
LE: loop exit
PB: predicated region body
PF: predicated region fallthrough
CT: control target
= control target key end

     0   :  { %7 = vsyncpa [#allocation3], 0  ;;  %s171_s0 = inlined_call_operand.hbm [shape: f32[8,256], index: 0, kind: input, shape index: {}]   ;;  %s172_s1 = inlined_call_operand.vmem [shape: f32[8,3], index: 1, kind: input, shape index: {}]   ;;  %s173_s2 = inlined_call_operand.hbm [shape: f32[8,256], index: 2, kind: output, shape index: {}]  }
   0x1   :  { %8 = vsyncpa [#allocation4], 0  ;;  %s124_s9 = smov [#allocation2]   ;;  %s76_s13 = scalar_lea.hbm %s171_s0, 256 }
   0x2   :  { %s15_s10 = sshll.u32 %s124_s9, 4  ;;  %p77_p0 = scmp.ne.s32.totalorder %s171_s0, %s76_s13  ;;  %s16_s10 = int_to_ptr.vmem [resolvable:$true] %s15_s10 }
   0x3   :  { %p80_p1 = scmp.lt.u32.totalorder %s76_s13, %s171_s0 }
   0x5   :  { %p82_p2 = pnand %p80_p1, %p77_p0 }
   0x7   :  { %85 = shalt.err (!%p82_p2)
}
   0x8   :  { %s86_s18 = scalar_lea.vmem %s16_s10, 256  ;;  %p91_p4 = scmp.lt.s32.totalorder %s16_s10, %s16_s10 }
   0x9   :  { %p87_p3 = scmp.ne.s32.totalorder %s16_s10, %s86_s18  ;;  %p92_p5 = scmp.lt.s32.totalorder %s86_s18, %s86_s18 }
   0xb   :  { %p93_p6 = por %p92_p5, %p91_p4 }
   0xd   :  { %p94_p7 = pnand %p93_p6, %p87_p3 }
   0xf   :  { %97 = shalt.err (!%p94_p7)
}
  0x10   :  { %18 = dma.hbm_to_vmem [thread:$0]  %s171_s0, 256, %s16_s10, [#allocation3]  }
  0x11   :  { %120 = dma.done.wait [#allocation3], 256  }
  0x12   :  { %121 = vsyncadd [#allocation3], 4294967040  ;;  %v125_v0 = vmov 0   ;;  %v126_v1 = vmov 2   ;;  %v26_v2 = vld [vmem:[%s172_s1] sm:$0xff]  ;;  %v127_v3 = vmov 1  }
  0x13   :  { %72 = vset.pattern.permute.xlu0 %v125_v0  ;;  %74 = vset.pattern.permute.xlu1 %v126_v1  ;;  %v24_v5 = vld [vmem:[#allocation2] sm:$0xff]  ;;  %v25_v6 = vld [vmem:[#allocation2 + $0x8] sm:$0xff]  ;;  %s128_s0 = smov [#allocation5]  }
  0x14   :  { %29 = vperm.xlu0 %72, %v26_v2   ;;  %43 = vperm.xlu1 %74, %v26_v2   ;;  %s58_s23 = sshll.u32 %s128_s0, 4  ;;  %s59_s23 = int_to_ptr.vmem [resolvable:$true] %s58_s23 }
  0x15   :  { %s98_s1 = scalar_lea.vmem %s59_s23, 256  ;;  %p103_p9 = scmp.lt.s32.totalorder %s59_s23, %s59_s23 }
  0x16   :  { %p99_p8 = scmp.ne.s32.totalorder %s59_s23, %s98_s1  ;;  %p104_p10 = scmp.lt.s32.totalorder %s98_s1, %s98_s1 }
  0x18   :  { %73 = vset.pattern.permute.xlu0 %v127_v3  ;;  %p105_p11 = por %p104_p10, %p103_p9 }
  0x19   :  { %35 = vperm.xlu0 %73, %v26_v2  }
  0x1a   :  { %p106_p12 = pnand %p105_p11, %p99_p8 }
  0x1d   :  { %75 = vset.pattern.permute.xlu0 %v126_v1 }
  0x93   :  { %v30_v4 = vpop.permute.xlu0 %29  ;;  %v44_v10 = vpop.permute.xlu1 %43 }
  0x94   :  { %v32_v7 = vmul.f32 %v30_v4, %v24_v5  ;;  %v33_v8 = vmul.f32 %v30_v4, %v25_v6 }
  0x98   :  { %v36_v9 = vpop.permute.xlu0 %35 }
  0x99   :  { %v38_v11 = vadd.f32 %v36_v9, %v32_v7  ;;  %v39_v12 = vadd.f32 %v36_v9, %v33_v8 }
  0x9b   :  { %vm40_vm0 = vcmp.gt.f32.partialorder %v38_v11, 0.0  ;;  %vm41_vm1 = vcmp.gt.f32.partialorder %v39_v12, 0.0  ;;  %v46_v13 = vmul.f32 %v44_v10, %v38_v11  ;;  %v47_v14 = vmul.f32 %v44_v10, %v39_v12 }
  0x9d   :  { %v48_v15 = vsel %vm40_vm0, %v38_v11, %v46_v13  ;;  %v49_v16 = vsel %vm41_vm1, %v39_v12, %v47_v14 }
  0x9e   :  { %50 = vst [vmem:[#allocation5] sm:$0xff] %v48_v15  ;;  %51 = vst [vmem:[#allocation5 + $0x8] sm:$0xff] %v49_v16 }
  0x9f   :  { %109 = shalt.err (!%p106_p12)
}
  0xa0   :  { %s110_s26 = scalar_lea.hbm %s173_s2, 256 }
  0xa1   :  { %p111_p13 = scmp.ne.s32.totalorder %s173_s2, %s110_s26  ;;  %p114_p0 = scmp.lt.u32.totalorder %s110_s26, %s173_s2 }
  0xa3   :  { %p116_p1 = pnand %p114_p0, %p111_p13 }
  0xa5   :  { %119 = shalt.err (!%p116_p1)
}
  0xa6   :  { %61 = dma.vmem_to_hbm [thread:$0]  %s59_s23, 256, %s173_s2, [#allocation4]  }
  0xa7   :  { %122 = dma.done.wait [#allocation4], 256  }
  0xa8   :  { %123 = vsyncadd [#allocation4], 4294967040 }
  0xa9   :  { %65 = vsyncpa [#allocation3], 1 }
  0xaa   :  { %66 = vsyncpa [#allocation4], 1 }

</bundles_post_ra>
